<compile_context>
chip_gen: v6e
topology: v6e:2x2x1
jax: 0.10.0
libtpu: 0.0.40
codegen_flags: <defaults>
</compile_context>

<pallas_src>
import jax
import jax.numpy as jnp
from jax.experimental import pallas as pl
from jax.experimental.pallas import tpu as pltpu

_SUBLANE = 8
_LANE = 128
_MIB = 1024 * 1024


def _round_up(v, m):
    return ((v + m - 1) // m) * m


def _tpu_flavor():
    """Coarse TPU-generation detection — used only for tuning knobs, never correctness."""
    try:
        kind = jax.devices()[0].device_kind.lower()
    except Exception:
        return "unknown"
    if "v7" in kind:
        return "v7"
    if "v6" in kind:
        return "v6"
    if "v5" in kind:
        return "v5"
    return "other"


def _tuning(flavor):
    """Return (tile VMEM budget, pallas vmem_limit_bytes) per generation.

    v5e/v6e: 128 MiB physical VMEM -> 32 MiB tile budget, 64 MiB scoped limit.
    v7x:     64 MiB per TC          -> 20 MiB tile budget, 48 MiB scoped limit.
    Unknown backends fall back to conservative defaults.
    """
    if flavor == "v7":
        return 20 * _MIB, 48 * _MIB
    if flavor in ("v5", "v6"):
        return 32 * _MIB, 64 * _MIB
    return 8 * _MIB, 32 * _MIB


def _choose_tile_n(n, c, x_itemsize, *, upcast_to_f32, vmem_budget_bytes,
                   max_tile_rows=None):
    """Largest multiple-of-8 row tile whose *padded* VMEM footprint fits the budget.

    Padded accounting: logits tile pads C up to a multiple of 128 lanes; the
    (tile_n, 1) int32 label column lane-pads 128x.  The two DMA'd tiles are
    double-buffered; in-kernel temporaries (optional f32 upcast + int32
    iota/masked) are single-buffered.
    """
    c_pad = _round_up(c, _LANE)
    dma_row = c_pad * x_itemsize + _LANE * 4                       # x tile + padded y column
    tmp_row = c_pad * (4 if upcast_to_f32 else x_itemsize) + c_pad * 4
    per_row = 2 * dma_row + tmp_row
    tile = vmem_budget_bytes // max(per_row, 1)
    tile = min(tile, _round_up(n, _SUBLANE))
    if max_tile_rows is not None:
        tile = min(tile, max_tile_rows)
    tile = max(_SUBLANE, (tile // _SUBLANE) * _SUBLANE)
    return int(tile)


def _make_eval_kernel(tile_n, num_tiles, rows_in_last, upcast_to_f32):
    has_remainder = rows_in_last != tile_n

    def kernel(x_ref, y_ref, out_ref):
        # forward() is abstract -> identity; x_ref holds this tile of logits.
        x = x_ref[...]
        if upcast_to_f32 and x.dtype != jnp.float32:
            # v5e / unknown backends: no bf16 VPU -> compute in f32.
            x = x.astype(jnp.float32)
        tn, c = x.shape

        # argmax over the class (last) axis with first-index tie-breaking,
        # matching torch.max(y_pred, 1).  bf16 equality vs the row max is exact.
        row_max = jnp.max(x, axis=1, keepdims=True)                    # (tile_n, 1)
        col_idx = jax.lax.broadcasted_iota(jnp.int32, x.shape, 1)
        masked = jnp.where(x == row_max, col_idx, jnp.int32(c))
        pred = jnp.min(masked, axis=1, keepdims=True)                  # (tile_n, 1)

        correct = (pred == y_ref[...]).astype(jnp.float32)             # (tile_n, 1)

        def write(c_vec):
            # Per-tile partial correct-count broadcast into the (8,128)-aligned,
            # lane-dense output block (unmasked stores, "parallel" grid axis).
            out_ref[...] = jnp.full(out_ref.shape, jnp.sum(c_vec), dtype=jnp.float32)

        if has_remainder:
            # Remainder masking only exists when N % tile_n != 0 and only runs on
            # the last tile; full tiles take the unmasked fast path below.
            is_last = pl.program_id(0) == num_tiles - 1

            @pl.when(is_last)
            def _():
                row_idx = jax.lax.broadcasted_iota(jnp.int32, (tn, 1), 0)
                write(jnp.where(row_idx < rows_in_last, correct, 0.0))

            @pl.when(jnp.logical_not(is_last))
            def _():
                write(correct)
        else:
            write(correct)

    return kernel


def evaluate(x, y, *, tile_n=None):
    """GeneralNet.evaluate: identity forward + argmax(dim=1) + accuracy.

    x: (N, C) logits (float32 or bfloat16), y: (N,) int labels -> scalar f32 accuracy.
    """
    n, c = x.shape
    y2d = y.reshape(n, 1).astype(jnp.int32)

    flavor = _tpu_flavor()
    budget, vmem_limit = _tuning(flavor)
    # Native-dtype math on bf16-capable VPUs (v6e/v7x); f32 upcast elsewhere.
    upcast_to_f32 = (x.dtype == jnp.bfloat16) and flavor not in ("v6", "v7")

    if tile_n is None:
        max_tile_rows = None
        if flavor == "v7":
            # Keep >= 2 tiles so the "parallel" grid axis feeds both TensorCores.
            max_tile_rows = _round_up(pl.cdiv(n, 2), _SUBLANE)
        tile_n = _choose_tile_n(n, c, x.dtype.itemsize,
                                upcast_to_f32=upcast_to_f32,
                                vmem_budget_bytes=budget,
                                max_tile_rows=max_tile_rows)

    num_tiles = pl.cdiv(n, tile_n)
    rows_in_last = n - (num_tiles - 1) * tile_n

    partials = pl.pallas_call(
        _make_eval_kernel(tile_n, num_tiles, rows_in_last, upcast_to_f32),
        out_shape=jax.ShapeDtypeStruct((num_tiles, _SUBLANE, _LANE), jnp.float32),
        grid=(num_tiles,),
        in_specs=[
            pl.BlockSpec((tile_n, c), lambda i: (i, 0)),
            pl.BlockSpec((tile_n, 1), lambda i: (i, 0)),
        ],
        out_specs=pl.BlockSpec((1, _SUBLANE, _LANE), lambda i: (i, 0, 0)),
        compiler_params=pltpu.CompilerParams(
            dimension_semantics=("parallel",),
            vmem_limit_bytes=vmem_limit,
        ),
    )(x, y2d)

    # Tiny final reduction over per-tile partial counts; divide by the TRUE N.
    return jnp.sum(partials[:, 0, 0]) / jnp.float32(n)


if __name__ == "__main__":
    key = jax.random.PRNGKey(0)
    kx, ky, kx2, ky2 = jax.random.split(key, 4)

    # Case 1: small single-tile batch, float32 logits.
    N1, C1 = 8, 16
    X1 = jax.random.normal(kx, (N1, C1), dtype=jnp.float32)
    y1 = jax.random.randint(ky, (N1,), 0, C1, dtype=jnp.int32)
    acc1 = jax.block_until_ready(evaluate(X1, y1))
    ref1 = jnp.mean((jnp.argmax(X1, axis=1).astype(jnp.int32) == y1).astype(jnp.float32))
    assert abs(float(acc1) - float(ref1)) < 1e-6, (float(acc1), float(ref1))

    # Case 2: bf16 logits kept bf16 on the wire (native bf16 math on v6e/v7x).
    N2, C2 = 200, 16
    X2 = jax.random.normal(kx2, (N2, C2), dtype=jnp.float32).astype(jnp.bfloat16)
    y2 = jax.random.randint(ky2, (N2,), 0, C2, dtype=jnp.int32)
    ref2 = jnp.mean((jnp.argmax(X2, axis=1).astype(jnp.int32) == y2).astype(jnp.float32))

    # 2a: forced small tile -> exercises multi-tile pipeline + last-tile remainder mask.
    acc2a = jax.block_until_ready(evaluate(X2, y2, tile_n=64))
    assert abs(float(acc2a) - float(ref2)) < 1e-6, (float(acc2a), float(ref2))

    # 2b: auto byte-sized tiles (generation-tuned budget) -> unmasked fast path.
    acc2b = jax.block_until_ready(evaluate(X2, y2))
    assert abs(float(acc2b) - float(ref2)) < 1e-6, (float(acc2b), float(ref2))

    print("KERNEL_OK")
</pallas_src>

<mosaic_0001>
module attributes {stable_mosaic.version = 11 : i64} {
  func.func @kernel(%arg0: i32, %arg1: memref<8x16xf32, #tpu.memory_space<vmem>>, %arg2: memref<8x1xi32, #tpu.memory_space<vmem>>, %arg3: memref<1x8x128xf32, #tpu.memory_space<vmem>>) attributes {dimension_semantics = [#tpu.dimension_semantics<parallel>], iteration_bounds = array<i64: 1>, scalar_prefetch = 0 : i64, scratch_operands = 0 : i64, tpu.core_type = #tpu.core_type<tc>, window_params = [{transform_indices = @transform_0, window_bounds = array<i64: 8, 16>}, {transform_indices = @transform_1, window_bounds = array<i64: 8, 1>}, {transform_indices = @transform_2, window_bounds = array<i64: 1, 8, 128>}]} {
    %c0 = arith.constant 0 : index
    %c0_0 = arith.constant 0 : index
    %0 = vector.load %arg1[%c0, %c0_0] : memref<8x16xf32, #tpu.memory_space<vmem>>, vector<8x16xf32>
    %cst = arith.constant dense<0xFF800000> : vector<8xf32>
    %1 = vector.multi_reduction <maximumf>, %0, %cst [1] : vector<8x16xf32> to vector<8xf32>
    %2 = vector.shape_cast %1 : vector<8xf32> to vector<8x1xf32>
    %3 = tpu.iota {dimensions = array<i32: 1>} : vector<8x16xi32>
    %4 = vector.broadcast %2 : vector<8x1xf32> to vector<8x16xf32>
    %5 = arith.cmpf oeq, %0, %4 : vector<8x16xf32>
    %c16_i32 = arith.constant 16 : i32
    %6 = vector.broadcast %c16_i32 : i32 to vector<8x16xi32>
    %7 = arith.select %5, %3, %6 : vector<8x16xi1>, vector<8x16xi32>
    %cst_1 = arith.constant dense<2147483647> : vector<8xi32>
    %8 = vector.multi_reduction <minsi>, %7, %cst_1 [1] : vector<8x16xi32> to vector<8xi32>
    %9 = vector.shape_cast %8 : vector<8xi32> to vector<8x1xi32>
    %c0_2 = arith.constant 0 : index
    %c0_3 = arith.constant 0 : index
    %10 = vector.load %arg2[%c0_2, %c0_3] : memref<8x1xi32, #tpu.memory_space<vmem>>, vector<8x1xi32>
    %11 = arith.cmpi eq, %9, %10 : vector<8x1xi32>
    %12 = arith.extui %11 : vector<8x1xi1> to vector<8x1xi32>
    %13 = arith.sitofp %12 : vector<8x1xi32> to vector<8x1xf32>
    %14 = vector.shape_cast %13 : vector<8x1xf32> to vector<1x8x1xf32>
    %cst_4 = arith.constant dense<0.000000e+00> : vector<1xf32>
    %15 = vector.multi_reduction <add>, %14, %cst_4 [1, 2] : vector<1x8x1xf32> to vector<1xf32>
    %16 = vector.shape_cast %15 : vector<1xf32> to vector<1x1x1xf32>
    %17 = vector.extract %16[0, 0, 0] : f32 from vector<1x1x1xf32>
    %18 = vector.broadcast %17 : f32 to vector<1x8x128xf32>
    %c0_5 = arith.constant 0 : index
    %c0_6 = arith.constant 0 : index
    %c0_7 = arith.constant 0 : index
    %19 = vector.load %arg3[%c0_5, %c0_6, %c0_7] : memref<1x8x128xf32, #tpu.memory_space<vmem>>, vector<1x8x128xf32>
    tpu.vector_store %arg3[%c0_5, %c0_6, %c0_7], %18 {strides = array<i32>} : memref<1x8x128xf32, #tpu.memory_space<vmem>>, vector<1x8x128xf32>,
    return
  }
  func.func @transform_0(%arg0: i32) -> (i32, i32) {
    %c0_i32 = arith.constant 0 : i32
    %c0_i32_0 = arith.constant 0 : i32
    return %arg0, %c0_i32 : i32, i32
  }
  func.func @transform_1(%arg0: i32) -> (i32, i32) {
    %c0_i32 = arith.constant 0 : i32
    %c0_i32_0 = arith.constant 0 : i32
    return %arg0, %c0_i32 : i32, i32
  }
  func.func @transform_2(%arg0: i32) -> (i32, i32, i32) {
    %c0_i32 = arith.constant 0 : i32
    %c0_i32_0 = arith.constant 0 : i32
    %c0_i32_1 = arith.constant 0 : i32
    return %arg0, %c0_i32, %c0_i32_0 : i32, i32, i32
  }
}

</mosaic_0001>

<bundles_post_ra>
// kernel: tpu_custom_call.1
= control target key start
LH: loop header
LB: loop body
LE: loop exit
PB: predicated region body
PF: predicated region fallthrough
CT: control target
= control target key end

     0   :  { %vm13_vm0 = vcmask 130048   ;;  %s120_s0 = inlined_call_operand.vmem [shape: f32[8,16], index: 0, kind: input, shape index: {}]   ;;  %s121_s1 = inlined_call_operand.vmem [shape: s32[8,1], index: 1, kind: input, shape index: {}]   ;;  %s122_s2 = inlined_call_operand.hbm [shape: f32[1,8,128], index: 2, kind: output, shape index: {}]  }
   0x1   :  { %v12_v0 = vld [vmem:[%s120_s0] sm:$0xff] }
   0x2   :  { %7 = vsyncpa [#allocation3], 0  ;;  %v14_v1 = vsel %vm13_vm0, %v12_v0, -inf  ;;  %v17_v2 = vlaneseq  ;;  %v36_v17 = vld [vmem:[%s121_s1] sm:$0xff]  ;;  %vm40_vm3 = vcmask 7168   ;;  %v94_v19 = vmov 0.0  }
   0x3   :  { %15 = vmax.xlane.f32.xlu0 %v14_v1  ;;  %s95_s12 = smov [#allocation2]  }
   0x4   :  { %v18_v3 = vand.u32 127, %v17_v2  ;;  %s59_s13 = sshll.u32 %s95_s12, 4  ;;  %s60_s13 = int_to_ptr.vmem [resolvable:$true] %s59_s13 }
   0x5   :  { %s72_s1 = scalar_lea.vmem %s60_s13, 128  ;;  %p77_p1 = scmp.lt.s32.totalorder %s60_s13, %s60_s13 }
   0x6   :  { %p73_p0 = scmp.ne.s32.totalorder %s60_s13, %s72_s1  ;;  %p78_p2 = scmp.lt.s32.totalorder %s72_s1, %s72_s1 }
   0x8   :  { %p79_p3 = por %p78_p2, %p77_p1 }
   0xa   :  { %p80_p4 = pnand %p79_p3, %p73_p0 }
  0x8c   :  { %v16_v4 = vpop.xlane.xlu0 %15 }
  0x8d   :  { %vm19_vm1 = vcmp.eq.f32.partialorder %v12_v0, %v16_v4 }
  0x8e   :  { %v20_v5 = vsel %vm19_vm1, %v18_v3, 16 }
  0x8f   :  { %v21_v6 = vsel %vm13_vm0, %v20_v5, 2147483647 }
  0x90   :  { %v23_v7 = vshra.s32 %v21_v6, 16  ;;  %v22_v9 = vand.u32 65535, %v21_v6 }
  0x92   :  { %v25_v8 = vcvt.s32.f32 %v23_v7  ;;  %v24_v11 = vcvt.s32.f32 %v22_v9 }
  0x94   :  { %26 = vmin.xlane.f32.xlu0 %v25_v8 }
 0x11d   :  { %v27_v10 = vpop.xlane.xlu0 %26 }
 0x11e   :  { %vm28_vm2 = vcmp.eq.f32.partialorder %v25_v8, %v27_v10  ;;  %v33_v13 = vcvt.f32.s32 %v27_v10 }
 0x11f   :  { %v29_v12 = vsel %vm28_vm2, %v24_v11, inf }
 0x120   :  { %30 = vmin.xlane.f32.xlu1 %v29_v12  ;;  %v34_v15 = vshll.u32 %v33_v13, 16 }
 0x1a9   :  { %v31_v14 = vpop.xlane.xlu1 %30 }
 0x1aa   :  { %v32_v16 = vcvt.f32.s32 %v31_v14 }
 0x1ac   :  { %v35_v18 = vadd.s32 %v34_v15, %v32_v16 }
 0x1ae   :  { %vm37_vm4 = vcmp.eq.s32.totalorder %v35_v18, %v36_v17 }
 0x1af   :  { %v67_v20 = vsel %vm37_vm4, 1.0, %v94_v19 }
 0x1b0   :  { %v41_v21 = vsel %vm40_vm3, %v67_v20, 0.0 }
 0x1b1   :  { %42 = vadd.xlane.f32.xlu1 %v41_v21 }
 0x23a   :  { %v43_v22 = vpop.xlane.xlu1 %42 }
 0x23b   :  { %v44_v23 = vrot.slane %v43_v22, 4 }
 0x23d   :  { %v45_v24 = vadd.f32 %v44_v23, %v43_v22 }
 0x23f   :  { %v46_v25 = vrot.slane %v45_v24, 2 }
 0x241   :  { %v47_v26 = vadd.f32 %v46_v25, %v45_v24 }
 0x243   :  { %v48_v27 = vrot.slane %v47_v26, 1 }
 0x245   :  { %v49_v28 = vadd.f32 %v48_v27, %v47_v26 }
 0x247   :  { %68 = vpush %v49_v28 }
 0x278   :  { %s69_s14 = spop %68 }
 0x279   :  { %v51_v29 = vstv %s69_s14 }
 0x27a   :  { %52 = vst [vmem:[#allocation2] sm:$0xff] %v51_v29 }
 0x27b   :  { %83 = shalt.err (!%p80_p4)
}
 0x27c   :  { %62 = dma.vmem_to_hbm [thread:$0]  %s60_s13, 128, %s122_s2, [#allocation3]  }
 0x27d   :  { %92 = dma.done.wait [#allocation3], 128  }
 0x27e   :  { %93 = vsyncadd [#allocation3], 4294967168 }
 0x27f   :  { %66 = vsyncpa [#allocation3], 1 }

</bundles_post_ra>
